<compile_context>
chip_gen: v7x
topology: tpu7x:2x2x1
jax: 0.10.0
libtpu: 0.0.40
codegen_flags: <defaults>
</compile_context>

<pallas_src>
import jax
import jax.numpy as jnp
from jax.experimental import pallas as pl
from jax.experimental.pallas import tpu as pltpu


def _mix_kernel(lamb_ref, a_ref, b_ref, o_ref):
    # lamb_ref: SMEM scalar (shape (1,)), already resolved to max(l, 1-l).
    # a_ref / b_ref / o_ref: VMEM tiles of the current grid block.
    l = lamb_ref[0]                                   # f32 scalar
    a = a_ref[...].astype(jnp.float32)
    b = b_ref[...].astype(jnp.float32)
    o_ref[...] = (a * l + b * (1.0 - l)).astype(o_ref.dtype)


def _pick_block(dim: int, target: int, align: int) -> int:
    """Largest block <= target that is a multiple of `align` and divides `dim`.

    Falls back to the full extent when `dim` is not `align`-aligned (allowed by
    the (8, 128) BlockSpec rule as long as the block equals the array dim).
    """
    if dim % align != 0:
        return dim
    b = min(target, dim)
    b -= b % align
    b = max(b, align)
    while dim % b != 0:
        b -= align
    return b


def pallas_mix(a: jax.Array, b: jax.Array, lamb: jax.Array,
               *, row_block: int = 256, lane_block: int = 1024) -> jax.Array:
    """Elementwise a*l + b*(1-l) with l = max(lamb, 1-lamb), on a 2D slab."""
    assert a.shape == b.shape and a.dtype == b.dtype and a.ndim == 2
    M, N = a.shape

    # Hoist the scalar resolution out of the grid loop; keep it in SMEM.
    l = jnp.maximum(lamb.astype(jnp.float32),
                    1.0 - lamb.astype(jnp.float32)).reshape((1,))

    bm = _pick_block(M, row_block, 8)      # sublane-aligned row block
    bn = _pick_block(N, lane_block, 128)   # lane-dense, 128-aligned block
    grid = (M // bm, N // bn)

    tile = pl.BlockSpec((bm, bn), lambda i, j: (i, j))

    # NOTE: if the caller does not need `a` afterwards, passing
    # input_output_aliases={1: 0} here would let XLA donate x1's HBM buffer
    # for the output.  Not enabled because the demo re-reads x1 below.
    return pl.pallas_call(
        _mix_kernel,
        out_shape=jax.ShapeDtypeStruct((M, N), a.dtype),
        grid=grid,
        in_specs=[
            pl.BlockSpec(memory_space=pltpu.MemorySpace.SMEM),  # lambda scalar
            tile,
            tile,
        ],
        out_specs=tile,
        compiler_params=pltpu.CompilerParams(
            dimension_semantics=("parallel", "parallel")),
    )(l, a, b)


def mixmatch_forward(x1, y1, x2, y2, lamb):
    """MixMatch forward: returns (x_mixed, y_mixed)."""
    B = x1.shape[0]
    # Flatten image tensors to a lane-dense 2D slab for the tiled kernel.
    x1f = x1.reshape(B, -1)
    x2f = x2.reshape(B, -1)
    x_mixed = pallas_mix(x1f, x2f, lamb).reshape(x1.shape)

    # Label mix: tiny (B, num_classes) tensor -> a separate pallas_call is pure
    # launch overhead with a sub-128-lane output; leave the few FLOPs to XLA.
    l = jnp.maximum(lamb, 1.0 - lamb).astype(y1.dtype)
    y_mixed = y1 * l + y2 * (1.0 - l)
    return x_mixed, y_mixed


if __name__ == "__main__":
    alpha = 0.75
    key = jax.random.PRNGKey(0)
    k_x1, k_x2, k_y1, k_y2, k_lamb = jax.random.split(key, 5)

    B, C, H, W = 2, 4, 16, 16
    num_classes = 10

    x1 = jax.random.normal(k_x1, (B, C, H, W), dtype=jnp.float32)
    x2 = jax.random.normal(k_x2, (B, C, H, W), dtype=jnp.float32)
    # one-hot-ish soft labels
    y1 = jax.nn.softmax(jax.random.normal(k_y1, (B, num_classes), jnp.float32), -1)
    y2 = jax.nn.softmax(jax.random.normal(k_y2, (B, num_classes), jnp.float32), -1)

    # Beta(alpha, alpha) sample (the stochastic part of the module, done in JAX glue).
    lamb = jax.random.beta(k_lamb, alpha, alpha, shape=(1,), dtype=jnp.float32)

    x_mixed, y_mixed = mixmatch_forward(x1, y1, x2, y2, lamb)
    jax.block_until_ready((x_mixed, y_mixed))

    # Reference check against plain-JAX semantics of the PyTorch forward.
    l_ref = jnp.maximum(lamb[0], 1.0 - lamb[0])
    x_ref = x1 * l_ref + x2 * (1.0 - l_ref)
    y_ref = y1 * l_ref + y2 * (1.0 - l_ref)
    assert jnp.allclose(x_mixed, x_ref, atol=1e-6)
    assert jnp.allclose(y_mixed, y_ref, atol=1e-6)
    assert x_mixed.shape == (B, C, H, W) and y_mixed.shape == (B, num_classes)

    # Second check exercising the real grid (multiple lane blocks).
    B2, C2, H2, W2 = 8, 3, 32, 32                     # flattened lanes = 3072
    xa = jax.random.normal(k_x1, (B2, C2, H2, W2), dtype=jnp.float32)
    xb = jax.random.normal(k_x2, (B2, C2, H2, W2), dtype=jnp.float32)
    xm = pallas_mix(xa.reshape(B2, -1), xb.reshape(B2, -1), lamb)
    xm = xm.reshape(B2, C2, H2, W2)
    jax.block_until_ready(xm)
    assert jnp.allclose(xm, xa * l_ref + xb * (1.0 - l_ref), atol=1e-6)

    print("KERNEL_OK")
</pallas_src>

<mosaic_0001>
module attributes {stable_mosaic.version = 11 : i64} {
  func.func @_mix_kernel(%arg0: i32, %arg1: i32, %arg2: memref<1xf32, #tpu.memory_space<smem>>, %arg3: memref<2x1024xf32, #tpu.memory_space<vmem>>, %arg4: memref<2x1024xf32, #tpu.memory_space<vmem>>, %arg5: memref<2x1024xf32, #tpu.memory_space<vmem>>) attributes {dimension_semantics = [#tpu.dimension_semantics<parallel>, #tpu.dimension_semantics<parallel>], iteration_bounds = array<i64: 1, 1>, scalar_prefetch = 0 : i64, scratch_operands = 0 : i64, tpu.core_type = #tpu.core_type<tc>, window_params = [{transform_indices = @transform_0, window_bounds = array<i64: 1>}, {transform_indices = @transform_1, window_bounds = array<i64: 2, 1024>}, {transform_indices = @transform_2, window_bounds = array<i64: 2, 1024>}, {transform_indices = @transform_3, window_bounds = array<i64: 2, 1024>}]} {
    %c0 = arith.constant 0 : index
    %0 = memref.load %arg2[%c0] : memref<1xf32, #tpu.memory_space<smem>>
    %c0_0 = arith.constant 0 : index
    %c0_1 = arith.constant 0 : index
    %1 = vector.load %arg3[%c0_0, %c0_1] : memref<2x1024xf32, #tpu.memory_space<vmem>>, vector<2x1024xf32>
    %c0_2 = arith.constant 0 : index
    %c0_3 = arith.constant 0 : index
    %2 = vector.load %arg4[%c0_2, %c0_3] : memref<2x1024xf32, #tpu.memory_space<vmem>>, vector<2x1024xf32>
    %3 = vector.broadcast %0 : f32 to vector<2x1024xf32>
    %4 = arith.mulf %1, %3 : vector<2x1024xf32>
    %cst = arith.constant 1.000000e+00 : f32
    %5 = arith.subf %cst, %0 : f32
    %6 = vector.broadcast %5 : f32 to vector<2x1024xf32>
    %7 = arith.mulf %2, %6 : vector<2x1024xf32>
    %8 = arith.addf %4, %7 : vector<2x1024xf32>
    %c0_4 = arith.constant 0 : index
    %c0_5 = arith.constant 0 : index
    %9 = vector.load %arg5[%c0_4, %c0_5] : memref<2x1024xf32, #tpu.memory_space<vmem>>, vector<2x1024xf32>
    tpu.vector_store %arg5[%c0_4, %c0_5], %8 {strides = array<i32>} : memref<2x1024xf32, #tpu.memory_space<vmem>>, vector<2x1024xf32>,
    return
  }
  func.func @transform_0(%arg0: i32, %arg1: i32) -> i32 {
    %c0_i32 = arith.constant 0 : i32
    %c0_i32_0 = arith.constant 0 : i32
    return %c0_i32 : i32
  }
  func.func @transform_1(%arg0: i32, %arg1: i32) -> (i32, i32) {
    %c0_i32 = arith.constant 0 : i32
    return %arg0, %arg1 : i32, i32
  }
  func.func @transform_2(%arg0: i32, %arg1: i32) -> (i32, i32) {
    %c0_i32 = arith.constant 0 : i32
    return %arg0, %arg1 : i32, i32
  }
  func.func @transform_3(%arg0: i32, %arg1: i32) -> (i32, i32) {
    %c0_i32 = arith.constant 0 : i32
    return %arg0, %arg1 : i32, i32
  }
}

</mosaic_0001>

<bundles_post_ra>
// kernel: tpu_custom_call.1
= control target key start
LH: loop header
LB: loop body
LE: loop exit
PB: predicated region body
PF: predicated region fallthrough
CT: control target
= control target key end

     0   :  { %9 = vsyncpa [#allocation4], 0  ;;  %s212_s0 = inlined_call_operand.<no memory space> [shape: f32[1], index: 0, kind: input, shape index: {}]   ;;  %s213_s1 = inlined_call_operand.hbm [shape: f32[2,1024], index: 1, kind: input, shape index: {}]   ;;  %s214_s2 = inlined_call_operand.hbm [shape: f32[2,1024], index: 2, kind: input, shape index: {}]   ;;  %s215_s3 = inlined_call_operand.hbm [shape: f32[2,1024], index: 3, kind: output, shape index: {}]  }
   0x1   :  { %10 = vsyncpa [#allocation7], 0 }
   0x2   :  { %11 = vsyncpa [#allocation5], 0  ;;  %s147_s12 = smov [#allocation3]   ;;  %s148_s14 = smov [#allocation6]  }
   0x3   :  { %s20_s13 = sshll.u32 %s147_s12, 4  ;;  %s30_s15 = sshll.u32 %s148_s14, 4  ;;  %s21_s13 = int_to_ptr.vmem [resolvable:$true] %s20_s13  ;;  %s31_s15 = int_to_ptr.vmem [resolvable:$true] %s30_s15 }
   0x4   :  { %s75_s18 = scalar_lea.hbm %s213_s1, 256 }
   0x5   :  { %p76_p0 = scmp.ne.s32.totalorder %s213_s1, %s75_s18  ;;  %p79_p1 = scmp.lt.u32.totalorder %s75_s18, %s213_s1 }
   0x7   :  { %p81_p2 = pnand %p79_p1, %p76_p0 }
   0x9   :  { %84 = shalt.err (!%p81_p2)
}
   0xa   :  { %s85_s23 = scalar_lea.vmem %s21_s13, 256  ;;  %p90_p4 = scmp.lt.s32.totalorder %s21_s13, %s21_s13 }
   0xb   :  { %p86_p3 = scmp.ne.s32.totalorder %s21_s13, %s85_s23  ;;  %p91_p5 = scmp.lt.s32.totalorder %s85_s23, %s85_s23 }
   0xd   :  { %p92_p6 = por %p91_p5, %p90_p4 }
   0xf   :  { %p93_p7 = pnand %p92_p6, %p86_p3 }
  0x11   :  { %96 = shalt.err (!%p93_p7)
}
  0x12   :  { %23 = dma.hbm_to_vmem [thread:$0]  %s213_s1, 256, %s21_s13, [#allocation4]  }
  0x13   :  { %s97_s28 = scalar_lea.hbm %s214_s2, 256 }
  0x14   :  { %p98_p8 = scmp.ne.s32.totalorder %s214_s2, %s97_s28  ;;  %p101_p9 = scmp.lt.u32.totalorder %s97_s28, %s214_s2 }
  0x16   :  { %p103_p10 = pnand %p101_p9, %p98_p8 }
  0x18   :  { %106 = shalt.err (!%p103_p10)
}
  0x19   :  { %s107_s6 = scalar_lea.vmem %s31_s15, 256  ;;  %p112_p12 = scmp.lt.s32.totalorder %s31_s15, %s31_s15 }
  0x1a   :  { %p108_p11 = scmp.ne.s32.totalorder %s31_s15, %s107_s6  ;;  %p113_p13 = scmp.lt.s32.totalorder %s107_s6, %s107_s6 }
  0x1c   :  { %p114_p0 = por %p113_p13, %p112_p12 }
  0x1e   :  { %p115_p1 = pnand %p114_p0, %p108_p11 }
  0x20   :  { %118 = shalt.err (!%p115_p1)
}
  0x21   :  { %33 = dma.hbm_to_vmem [thread:$0]  %s214_s2, 256, %s31_s15, [#allocation7]  }
  0x22   :  { %141 = dma.done.wait [#allocation4], 256  }
  0x23   :  { %142 = vsyncadd [#allocation4], 4294967040 }
  0x24   :  { %143 = dma.done.wait [#allocation7], 256  }
  0x25   :  { %144 = vsyncadd [#allocation7], 4294967040  ;;  %s48_s10 = ssub.f32 1.0, %s212_s0  ;;  %v45_v0 = vstv %s212_s0  ;;  %v41_v2 = vld [vmem:[#allocation3] sm:$0xff]  ;;  %v43_v3 = vld [vmem:[#allocation6] sm:$0xff]  ;;  %s149_s2 = smov [#allocation8]  }
  0x26   :  { %v42_v4 = vld [vmem:[#allocation3 + $0x8] sm:$0xff]  ;;  %v46_v5 = vmul.f32 %v45_v0, %v41_v2  ;;  %v44_v7 = vld [vmem:[#allocation6 + $0x8] sm:$0xff]  ;;  %s62_s13 = sshll.u32 %s149_s2, 4  ;;  %s63_s13 = int_to_ptr.vmem [resolvable:$true] %s62_s13 }
  0x27   :  { %v49_v1 = vstv %s48_s10  ;;  %v47_v8 = vmul.f32 %v45_v0, %v42_v4  ;;  %s119_s14 = scalar_lea.vmem %s63_s13, 256  ;;  %p124_p3 = scmp.lt.s32.totalorder %s63_s13, %s63_s13 }
  0x28   :  { %v50_v6 = vmul.f32 %v49_v1, %v43_v3  ;;  %v51_v9 = vmul.f32 %v49_v1, %v44_v7  ;;  %p120_p2 = scmp.ne.s32.totalorder %s63_s13, %s119_s14  ;;  %p125_p4 = scmp.lt.s32.totalorder %s119_s14, %s119_s14 }
  0x2a   :  { %v52_v10 = vadd.f32 %v50_v6, %v46_v5  ;;  %v53_v11 = vadd.f32 %v51_v9, %v47_v8  ;;  %p126_p5 = por %p125_p4, %p124_p3 }
  0x2c   :  { %54 = vst [vmem:[#allocation8] sm:$0xff] %v52_v10  ;;  %55 = vst [vmem:[#allocation8 + $0x8] sm:$0xff] %v53_v11  ;;  %p127_p6 = pnand %p126_p5, %p120_p2 }
  0x2e   :  { %130 = shalt.err (!%p127_p6)
}
  0x2f   :  { %s131_s16 = scalar_lea.hbm %s215_s3, 256 }
  0x30   :  { %p132_p7 = scmp.ne.s32.totalorder %s215_s3, %s131_s16  ;;  %p135_p8 = scmp.lt.u32.totalorder %s131_s16, %s215_s3 }
  0x32   :  { %p137_p9 = pnand %p135_p8, %p132_p7 }
  0x34   :  { %140 = shalt.err (!%p137_p9)
}
  0x35   :  { %65 = dma.vmem_to_hbm [thread:$0]  %s63_s13, 256, %s215_s3, [#allocation5]  }
  0x36   :  { %145 = dma.done.wait [#allocation5], 256  }
  0x37   :  { %146 = vsyncadd [#allocation5], 4294967040 }
  0x38   :  { %69 = vsyncpa [#allocation4], 1 }
  0x39   :  { %70 = vsyncpa [#allocation7], 1 }
  0x3a   :  { %71 = vsyncpa [#allocation5], 1 }

</bundles_post_ra>
